<compile_context>
chip_gen: v7x
topology: tpu7x:2x2x1
jax: 0.10.0
libtpu: 0.0.40
codegen_flags: <defaults>
</compile_context>

<pallas_src>
import math

import jax
import jax.numpy as jnp
from jax.experimental import pallas as pl
from jax.experimental.pallas import tpu as pltpu


def _gelu_exact(x):
    # Matches torch.nn.GELU() default (erf-based, not tanh approximation).
    return 0.5 * x * (1.0 + jax.lax.erf(x * (1.0 / math.sqrt(2.0))))


def _round_up(n, m):
    return ((n + m - 1) // m) * m


def _pad_to(a, shape):
    pads = [(0, t - s) for s, t in zip(a.shape, shape)]
    if any(p[1] for p in pads):
        return jnp.pad(a, pads)
    return a


# -----------------------------------------------------------------------------
# Kernel
# -----------------------------------------------------------------------------
def mlp_kernel(x_ref, w1_ref, b1_ref, w2_ref, b2_ref, w3_ref, b3_ref,
               o_ref, h_ref):
    # fc1: cast the f32 x tile to bf16 right at the MXU input; f32 accumulate.
    x_bf16 = x_ref[...].astype(jnp.bfloat16)
    h1 = jnp.dot(x_bf16, w1_ref[...],
                 preferred_element_type=jnp.float32) + b1_ref[...]
    # GELU in f32 on the VPU, store directly as bf16 (what fc2 consumes anyway).
    h_ref[...] = _gelu_exact(h1).astype(jnp.bfloat16)

    # fc2 + GELU, reusing the same bf16 scratch buffer.
    h2 = jnp.dot(h_ref[...], w2_ref[...],
                 preferred_element_type=jnp.float32) + b2_ref[...]
    h_ref[...] = _gelu_exact(h2).astype(jnp.bfloat16)

    # fc3 (no activation), lane-dense f32 store.
    out = jnp.dot(h_ref[...], w3_ref[...],
                  preferred_element_type=jnp.float32) + b3_ref[...]
    o_ref[...] = out.astype(o_ref.dtype)


# -----------------------------------------------------------------------------
# Wrapper helpers
# -----------------------------------------------------------------------------
def _vmem_capacity_bytes():
    try:
        return int(pltpu.get_tpu_info().vmem_capacity_bytes)
    except Exception:
        return 64 << 20  # conservative (v7x per-core VMEM)


def _budget_bytes(tb, in_p, hid_p, out_p):
    # Single-buffered bf16 weights + f32 biases (constant index_map, Buffered(1)).
    weight_bytes = 2 * (in_p * hid_p + hid_p * hid_p + hid_p * out_p)
    bias_bytes = 4 * (2 * hid_p + out_p)
    # Double-buffered f32 x / f32 out tiles.
    io_bytes = 2 * (tb * in_p * 4 + tb * out_p * 4)
    # One shared bf16 activation scratch.
    scratch_bytes = tb * hid_p * 2
    return weight_bytes + bias_bytes + io_bytes + scratch_bytes


def _resident_spec(shape):
    # Constant index_map -> block is loaded once; single-buffer it to save VMEM.
    index_map = lambda i: (0, 0)
    if hasattr(pl, "Buffered"):
        try:
            return pl.BlockSpec(shape, index_map, pipeline_mode=pl.Buffered(1))
        except TypeError:
            pass
    return pl.BlockSpec(shape, index_map)


def _batch_dim_semantics(num_steps):
    # On v7x (2 TensorCores / chip) shard the batch grid axis across cores.
    try:
        kind = jax.devices()[0].device_kind.lower()
    except Exception:
        kind = ""
    if ("v7" in kind and num_steps >= 2 and num_steps % 2 == 0
            and hasattr(pltpu, "CORE_PARALLEL")):
        return (pltpu.CORE_PARALLEL,)
    return ("parallel",)


def prepare_params(w1, b1, w2, b2, w3, b3):
    """Pad to lane-dense (128-multiple) feature dims and cast weights to bf16 ONCE."""
    in_dim, hidden = w1.shape
    out_dim = w3.shape[1]
    in_p = _round_up(in_dim, 128)
    hid_p = _round_up(hidden, 128)
    out_p = _round_up(out_dim, 128)
    prepared = (
        _pad_to(w1, (in_p, hid_p)).astype(jnp.bfloat16),
        _pad_to(b1, (1, hid_p)).astype(jnp.float32),
        _pad_to(w2, (hid_p, hid_p)).astype(jnp.bfloat16),
        _pad_to(b2, (1, hid_p)).astype(jnp.float32),
        _pad_to(w3, (hid_p, out_p)).astype(jnp.bfloat16),
        _pad_to(b3, (1, out_p)).astype(jnp.float32),
    )
    return prepared, (in_dim, hidden, out_dim)


def mlp_forward(x, prepared, dims, *, tile_b=512):
    """x: [B, in_dim] f32. prepared: pre-padded/cast params from prepare_params."""
    w1_p, b1_p, w2_p, b2_p, w3_p, b3_p = prepared
    in_dim, hidden, out_dim = dims
    B = x.shape[0]
    assert x.shape[1] == in_dim

    in_p, hid_p = w1_p.shape
    out_p = w3_p.shape[1]

    # Generation-aware VMEM cap: ~48 MiB on 64-MiB parts (v7x), ~96 MiB on 128-MiB parts.
    cap = _vmem_capacity_bytes() * 3 // 4
    headroom = 4 << 20

    # Pick the largest batch tile that fits the VMEM budget (sweepable via tile_b).
    tb = _round_up(max(tile_b, 16), 16)
    while tb > 16 and _budget_bytes(tb, in_p, hid_p, out_p) + headroom > cap:
        tb //= 2
    tb = max(tb, 16)

    if B <= tb:
        # bf16 activation scratch packs 16 sublanes per vreg -> round tile to 16.
        tb = _round_up(B, 16)
    b_pad = _round_up(B, tb)
    grid = (b_pad // tb,)

    # Pad x (zero padding is exact: GELU(0)=0, zero rows/cols contribute nothing).
    # Keep x in f32; the bf16 cast happens inside the kernel at the MXU input.
    x_p = _pad_to(x, (b_pad, in_p)).astype(jnp.float32)

    need = _budget_bytes(tb, in_p, hid_p, out_p) + headroom
    vmem_limit = int(min(max(need, 8 << 20), cap))

    mm_elems = in_p * hid_p + hid_p * hid_p + hid_p * out_p
    cost = pl.CostEstimate(
        flops=2 * b_pad * mm_elems,
        transcendentals=2 * b_pad * hid_p,
        bytes_accessed=(b_pad * in_p * 4            # x (f32)
                        + 2 * mm_elems              # bf16 weights, read once
                        + 4 * (2 * hid_p + out_p)   # f32 biases
                        + b_pad * out_p * 4),       # f32 output
    )

    out = pl.pallas_call(
        mlp_kernel,
        out_shape=jax.ShapeDtypeStruct((b_pad, out_p), jnp.float32),
        grid=grid,
        in_specs=[
            pl.BlockSpec((tb, in_p), lambda i: (i, 0)),   # x tile (f32, batch-tiled)
            _resident_spec((in_p, hid_p)),                # w1 (resident, single-buffered)
            _resident_spec((1, hid_p)),                   # b1
            _resident_spec((hid_p, hid_p)),               # w2
            _resident_spec((1, hid_p)),                   # b2
            _resident_spec((hid_p, out_p)),               # w3
            _resident_spec((1, out_p)),                   # b3
        ],
        out_specs=pl.BlockSpec((tb, out_p), lambda i: (i, 0)),
        scratch_shapes=[
            pltpu.VMEM((tb, hid_p), jnp.bfloat16),        # shared activation scratch
        ],
        compiler_params=pltpu.CompilerParams(
            dimension_semantics=_batch_dim_semantics(grid[0]),
            vmem_limit_bytes=vmem_limit,
        ),
        cost_estimate=cost,
    )(x_p, w1_p, b1_p, w2_p, b2_p, w3_p, b3_p)

    return out[:B, :out_dim]


# -----------------------------------------------------------------------------
# Param init + references
# -----------------------------------------------------------------------------
def init_params(key, in_dim, out_dim, hidden_size):
    # Deterministic init mimicking nn.Linear's uniform(-1/sqrt(fan_in), +...).
    keys = jax.random.split(key, 6)

    def linear(kw, kb, fan_in, fan_out):
        bound = 1.0 / math.sqrt(fan_in)
        w = jax.random.uniform(kw, (fan_in, fan_out), jnp.float32, -bound, bound)
        b = jax.random.uniform(kb, (1, fan_out), jnp.float32, -bound, bound)
        return w, b

    w1, b1 = linear(keys[0], keys[1], in_dim, hidden_size)
    w2, b2 = linear(keys[2], keys[3], hidden_size, hidden_size)
    w3, b3 = linear(keys[4], keys[5], hidden_size, out_dim)
    return w1, b1, w2, b2, w3, b3


def _ref_bf16(x, w1, b1, w2, b2, w3, b3):
    # Plain-JAX reference with the same bf16-input / f32-accumulate dot path.
    def dot_bf16(a, w):
        return jnp.dot(a.astype(jnp.bfloat16), w.astype(jnp.bfloat16),
                       preferred_element_type=jnp.float32)
    h = _gelu_exact(dot_bf16(x, w1) + b1)
    h = _gelu_exact(dot_bf16(h, w2) + b2)
    return dot_bf16(h, w3) + b3


def _ref_f32(x, w1, b1, w2, b2, w3, b3):
    h = _gelu_exact(x @ w1 + b1)
    h = _gelu_exact(h @ w2 + b2)
    return h @ w3 + b3


if __name__ == "__main__":
    key = jax.random.PRNGKey(0)
    k_x, k_p, k_x2 = jax.random.split(key, 3)

    in_dim, hidden, out_dim = 32, 256, 16
    raw_params = init_params(k_p, in_dim, out_dim, hidden)
    prepared, dims = prepare_params(*raw_params)   # pad + bf16-cast weights once

    # Case 1: small batch (single grid step, 16-row padded tile).
    B = 8
    x = jax.random.normal(k_x, (B, in_dim), dtype=jnp.float32)
    out = jax.block_until_ready(mlp_forward(x, prepared, dims))
    assert out.shape == (B, out_dim)
    assert jnp.max(jnp.abs(out - _ref_bf16(x, *raw_params))) < 2e-3
    assert jnp.max(jnp.abs(out - _ref_f32(x, *raw_params))) < 5e-2

    # Case 2: exercise the batch grid (640 rows, tile 256 -> 3 grid steps w/ padding).
    B2 = 640
    x2 = jax.random.normal(k_x2, (B2, in_dim), dtype=jnp.float32)
    out2 = jax.block_until_ready(mlp_forward(x2, prepared, dims, tile_b=256))
    assert out2.shape == (B2, out_dim)
    assert jnp.max(jnp.abs(out2 - _ref_bf16(x2, *raw_params))) < 2e-3
    assert jnp.max(jnp.abs(out2 - _ref_f32(x2, *raw_params))) < 5e-2

    print("KERNEL_OK")
</pallas_src>

<mosaic_0001>
module attributes {stable_mosaic.version = 11 : i64} {
  func.func @mlp_kernel(%arg0: i32, %arg1: memref<16x128xf32, #tpu.memory_space<vmem>>, %arg2: memref<128x256xbf16, #tpu.memory_space<vmem>>, %arg3: memref<1x256xf32, #tpu.memory_space<vmem>>, %arg4: memref<256x256xbf16, #tpu.memory_space<vmem>>, %arg5: memref<1x256xf32, #tpu.memory_space<vmem>>, %arg6: memref<256x128xbf16, #tpu.memory_space<vmem>>, %arg7: memref<1x128xf32, #tpu.memory_space<vmem>>, %arg8: memref<16x128xf32, #tpu.memory_space<vmem>>, %arg9: memref<16x256xbf16, #tpu.memory_space<vmem>>) attributes {dimension_semantics = [#tpu.dimension_semantics<parallel>], iteration_bounds = array<i64: 1>, scalar_prefetch = 0 : i64, scratch_operands = 1 : i64, tpu.core_type = #tpu.core_type<tc>, window_params = [{transform_indices = @transform_0, window_bounds = array<i64: 16, 128>}, {pipeline_mode = #tpu.pipeline_mode<synchronous>, transform_indices = @transform_1, window_bounds = array<i64: 128, 256>}, {pipeline_mode = #tpu.pipeline_mode<synchronous>, transform_indices = @transform_2, window_bounds = array<i64: 1, 256>}, {pipeline_mode = #tpu.pipeline_mode<synchronous>, transform_indices = @transform_3, window_bounds = array<i64: 256, 256>}, {pipeline_mode = #tpu.pipeline_mode<synchronous>, transform_indices = @transform_4, window_bounds = array<i64: 1, 256>}, {pipeline_mode = #tpu.pipeline_mode<synchronous>, transform_indices = @transform_5, window_bounds = array<i64: 256, 128>}, {pipeline_mode = #tpu.pipeline_mode<synchronous>, transform_indices = @transform_6, window_bounds = array<i64: 1, 128>}, {transform_indices = @transform_7, window_bounds = array<i64: 16, 128>}]} {
    %c0 = arith.constant 0 : index
    %c0_0 = arith.constant 0 : index
    %0 = vector.load %arg1[%c0, %c0_0] : memref<16x128xf32, #tpu.memory_space<vmem>>, vector<16x128xf32>
    %1 = arith.truncf %0 : vector<16x128xf32> to vector<16x128xbf16>
    %c0_1 = arith.constant 0 : index
    %c0_2 = arith.constant 0 : index
    %2 = vector.load %arg2[%c0_1, %c0_2] : memref<128x256xbf16, #tpu.memory_space<vmem>>, vector<128x256xbf16>
    %cst = arith.constant dense<0.000000e+00> : vector<16x256xf32>
    %3 = tpu.matmul %1, %2, %cst {dimension_numbers = #tpu.dot_dimension_numbers<[1], [0], [0], [1], [0, 0, 1, 1], [], []>} : vector<16x128xbf16>, vector<128x256xbf16>, vector<16x256xf32> -> vector<16x256xf32>
    %c0_3 = arith.constant 0 : index
    %c0_4 = arith.constant 0 : index
    %4 = vector.load %arg3[%c0_3, %c0_4] : memref<1x256xf32, #tpu.memory_space<vmem>>, vector<1x256xf32>
    %5 = vector.broadcast %4 : vector<1x256xf32> to vector<16x256xf32>
    %6 = arith.addf %3, %5 : vector<16x256xf32>
    %cst_5 = arith.constant 5.000000e-01 : f32
    %7 = vector.broadcast %cst_5 : f32 to vector<16x256xf32>
    %8 = arith.mulf %7, %6 : vector<16x256xf32>
    %cst_6 = arith.constant 0.707106769 : f32
    %9 = vector.broadcast %cst_6 : f32 to vector<16x256xf32>
    %10 = arith.mulf %6, %9 : vector<16x256xf32>
    %11 = math.erf %10 : vector<16x256xf32>
    %cst_7 = arith.constant 1.000000e+00 : f32
    %12 = vector.broadcast %cst_7 : f32 to vector<16x256xf32>
    %13 = arith.addf %12, %11 : vector<16x256xf32>
    %14 = arith.mulf %8, %13 : vector<16x256xf32>
    %15 = arith.truncf %14 : vector<16x256xf32> to vector<16x256xbf16>
    %c0_8 = arith.constant 0 : index
    %c0_9 = arith.constant 0 : index
    %16 = vector.load %arg9[%c0_8, %c0_9] : memref<16x256xbf16, #tpu.memory_space<vmem>>, vector<16x256xbf16>
    tpu.vector_store %arg9[%c0_8, %c0_9], %15 {strides = array<i32>} : memref<16x256xbf16, #tpu.memory_space<vmem>>, vector<16x256xbf16>,
    %c0_10 = arith.constant 0 : index
    %c0_11 = arith.constant 0 : index
    %17 = vector.load %arg9[%c0_10, %c0_11] : memref<16x256xbf16, #tpu.memory_space<vmem>>, vector<16x256xbf16>
    %c0_12 = arith.constant 0 : index
    %c0_13 = arith.constant 0 : index
    %18 = vector.load %arg4[%c0_12, %c0_13] : memref<256x256xbf16, #tpu.memory_space<vmem>>, vector<256x256xbf16>
    %cst_14 = arith.constant dense<0.000000e+00> : vector<16x256xf32>
    %19 = tpu.matmul %17, %18, %cst_14 {dimension_numbers = #tpu.dot_dimension_numbers<[1], [0], [0], [1], [0, 0, 1, 1], [], []>} : vector<16x256xbf16>, vector<256x256xbf16>, vector<16x256xf32> -> vector<16x256xf32>
    %c0_15 = arith.constant 0 : index
    %c0_16 = arith.constant 0 : index
    %20 = vector.load %arg5[%c0_15, %c0_16] : memref<1x256xf32, #tpu.memory_space<vmem>>, vector<1x256xf32>
    %21 = vector.broadcast %20 : vector<1x256xf32> to vector<16x256xf32>
    %22 = arith.addf %19, %21 : vector<16x256xf32>
    %cst_17 = arith.constant 5.000000e-01 : f32
    %23 = vector.broadcast %cst_17 : f32 to vector<16x256xf32>
    %24 = arith.mulf %23, %22 : vector<16x256xf32>
    %cst_18 = arith.constant 0.707106769 : f32
    %25 = vector.broadcast %cst_18 : f32 to vector<16x256xf32>
    %26 = arith.mulf %22, %25 : vector<16x256xf32>
    %27 = math.erf %26 : vector<16x256xf32>
    %cst_19 = arith.constant 1.000000e+00 : f32
    %28 = vector.broadcast %cst_19 : f32 to vector<16x256xf32>
    %29 = arith.addf %28, %27 : vector<16x256xf32>
    %30 = arith.mulf %24, %29 : vector<16x256xf32>
    %31 = arith.truncf %30 : vector<16x256xf32> to vector<16x256xbf16>
    %c0_20 = arith.constant 0 : index
    %c0_21 = arith.constant 0 : index
    %32 = vector.load %arg9[%c0_20, %c0_21] : memref<16x256xbf16, #tpu.memory_space<vmem>>, vector<16x256xbf16>
    tpu.vector_store %arg9[%c0_20, %c0_21], %31 {strides = array<i32>} : memref<16x256xbf16, #tpu.memory_space<vmem>>, vector<16x256xbf16>,
    %c0_22 = arith.constant 0 : index
    %c0_23 = arith.constant 0 : index
    %33 = vector.load %arg9[%c0_22, %c0_23] : memref<16x256xbf16, #tpu.memory_space<vmem>>, vector<16x256xbf16>
    %c0_24 = arith.constant 0 : index
    %c0_25 = arith.constant 0 : index
    %34 = vector.load %arg6[%c0_24, %c0_25] : memref<256x128xbf16, #tpu.memory_space<vmem>>, vector<256x128xbf16>
    %cst_26 = arith.constant dense<0.000000e+00> : vector<16x128xf32>
    %35 = tpu.matmul %33, %34, %cst_26 {dimension_numbers = #tpu.dot_dimension_numbers<[1], [0], [0], [1], [0, 0, 1, 1], [], []>} : vector<16x256xbf16>, vector<256x128xbf16>, vector<16x128xf32> -> vector<16x128xf32>
    %c0_27 = arith.constant 0 : index
    %c0_28 = arith.constant 0 : index
    %36 = vector.load %arg7[%c0_27, %c0_28] : memref<1x128xf32, #tpu.memory_space<vmem>>, vector<1x128xf32>
    %37 = vector.broadcast %36 : vector<1x128xf32> to vector<16x128xf32>
    %38 = arith.addf %35, %37 : vector<16x128xf32>
    %c0_29 = arith.constant 0 : index
    %c0_30 = arith.constant 0 : index
    %39 = vector.load %arg8[%c0_29, %c0_30] : memref<16x128xf32, #tpu.memory_space<vmem>>, vector<16x128xf32>
    tpu.vector_store %arg8[%c0_29, %c0_30], %38 {strides = array<i32>} : memref<16x128xf32, #tpu.memory_space<vmem>>, vector<16x128xf32>,
    return
  }
  func.func @transform_0(%arg0: i32) -> (i32, i32) {
    %c0_i32 = arith.constant 0 : i32
    %c0_i32_0 = arith.constant 0 : i32
    return %arg0, %c0_i32 : i32, i32
  }
  func.func @transform_1(%arg0: i32) -> (i32, i32) {
    %c0_i32 = arith.constant 0 : i32
    %c0_i32_0 = arith.constant 0 : i32
    %c0_i32_1 = arith.constant 0 : i32
    return %c0_i32, %c0_i32_0 : i32, i32
  }
  func.func @transform_2(%arg0: i32) -> (i32, i32) {
    %c0_i32 = arith.constant 0 : i32
    %c0_i32_0 = arith.constant 0 : i32
    %c0_i32_1 = arith.constant 0 : i32
    return %c0_i32, %c0_i32_0 : i32, i32
  }
  func.func @transform_3(%arg0: i32) -> (i32, i32) {
    %c0_i32 = arith.constant 0 : i32
    %c0_i32_0 = arith.constant 0 : i32
    %c0_i32_1 = arith.constant 0 : i32
    return %c0_i32, %c0_i32_0 : i32, i32
  }
  func.func @transform_4(%arg0: i32) -> (i32, i32) {
    %c0_i32 = arith.constant 0 : i32
    %c0_i32_0 = arith.constant 0 : i32
    %c0_i32_1 = arith.constant 0 : i32
    return %c0_i32, %c0_i32_0 : i32, i32
  }
  func.func @transform_5(%arg0: i32) -> (i32, i32) {
    %c0_i32 = arith.constant 0 : i32
    %c0_i32_0 = arith.constant 0 : i32
    %c0_i32_1 = arith.constant 0 : i32
    return %c0_i32, %c0_i32_0 : i32, i32
  }
  func.func @transform_6(%arg0: i32) -> (i32, i32) {
    %c0_i32 = arith.constant 0 : i32
    %c0_i32_0 = arith.constant 0 : i32
    %c0_i32_1 = arith.constant 0 : i32
    return %c0_i32, %c0_i32_0 : i32, i32
  }
  func.func @transform_7(%arg0: i32) -> (i32, i32) {
    %c0_i32 = arith.constant 0 : i32
    %c0_i32_0 = arith.constant 0 : i32
    return %arg0, %c0_i32 : i32, i32
  }
}

</mosaic_0001>

<bundles_post_ra>
// kernel: tpu_custom_call.1
= control target key start
LH: loop header
LB: loop body
LE: loop exit
PB: predicated region body
PF: predicated region fallthrough
CT: control target
= control target key end

     0   :  { %12 = vsyncpa [#allocation4], 0  ;;  %s1209_s0 = inlined_call_operand.hbm [shape: f32[16,128], index: 0, kind: input, shape index: {}]   ;;  %s1210_s1 = inlined_call_operand.hbm [shape: bf16[128,256], index: 1, kind: input, shape index: {}]   ;;  %s1211_s2 = inlined_call_operand.vmem [shape: f32[1,256], index: 2, kind: input, shape index: {}]   ;;  %s1212_s3 = inlined_call_operand.hbm [shape: bf16[256,256], index: 3, kind: input, shape index: {}]   ;;  %s1213_s4 = inlined_call_operand.vmem [shape: f32[1,256], index: 4, kind: input, shape index: {}]   ;;  %s1214_s5 = inlined_call_operand.hbm [shape: bf16[256,128], index: 5, kind: input, shape index: {}]   ;;  %s1215_s6 = inlined_call_operand.vmem [shape: f32[1,128], index: 6, kind: input, shape index: {}]   ;;  %s1216_s7 = inlined_call_operand.hbm [shape: f32[16,128], index: 7, kind: output, shape index: {}]  }
   0x1   :  { %13 = vsyncpa [#allocation7], 0 }
   0x2   :  { %14 = vsyncpa [#allocation10], 0 }
   0x3   :  { %15 = vsyncpa [#allocation5], 0  ;;  %s1052_s24 = smov [#allocation6]   ;;  %s1053_s26 = smov [#allocation3]  }
   0x4   :  { %s33_s25 = sshll.u32 %s1052_s24, 4  ;;  %s21_s27 = sshll.u32 %s1053_s26, 4  ;;  %s34_s25 = int_to_ptr.vmem [resolvable:$true] %s33_s25  ;;  %s1102_s27 = int_to_ptr.vmem [resolvable:$true] %s21_s27 }
   0x5   :  { %s934_s30 = scalar_lea.hbm %s1210_s1, 2048 }
   0x6   :  { %p935_p0 = scmp.ne.s32.totalorder %s1210_s1, %s934_s30  ;;  %p938_p1 = scmp.lt.u32.totalorder %s934_s30, %s1210_s1 }
   0x8   :  { %p940_p2 = pnand %p938_p1, %p935_p0 }
   0xa   :  { %943 = shalt.err (!%p940_p2)
}
   0xb   :  { %s944_s12 = scalar_lea.vmem %s34_s25, 2048  ;;  %p949_p4 = scmp.lt.s32.totalorder %s34_s25, %s34_s25 }
   0xc   :  { %p945_p3 = scmp.ne.s32.totalorder %s34_s25, %s944_s12  ;;  %p950_p5 = scmp.lt.s32.totalorder %s944_s12, %s944_s12 }
   0xe   :  { %p951_p6 = por %p950_p5, %p949_p4 }
  0x10   :  { %p952_p7 = pnand %p951_p6, %p945_p3 }
  0x12   :  { %955 = shalt.err (!%p952_p7)
}
  0x13   :  { %s1054_s13 = smov 128   ;;  %s1055_s14 = smov 8  }
  0x14   :  { %39 = dma.hbm_to_vmem [thread:$0]  %s1210_s1, 2048, %s34_s25, [#allocation7], %s1054_s13, %s1054_s13, %s1055_s14  }
  0x15   :  { %s956_s19 = scalar_lea.hbm %s1209_s0, 256 }
  0x16   :  { %p957_p8 = scmp.ne.s32.totalorder %s1209_s0, %s956_s19  ;;  %p960_p9 = scmp.lt.u32.totalorder %s956_s19, %s1209_s0 }
  0x18   :  { %p962_p10 = pnand %p960_p9, %p957_p8 }
  0x1a   :  { %965 = shalt.err (!%p962_p10)
}
  0x1b   :  { %s966_s24 = scalar_lea.vmem %s1102_s27, 256  ;;  %p971_p12 = scmp.lt.s32.totalorder %s1102_s27, %s1102_s27 }
  0x1c   :  { %p967_p11 = scmp.ne.s32.totalorder %s1102_s27, %s966_s24  ;;  %p972_p13 = scmp.lt.s32.totalorder %s966_s24, %s966_s24 }
  0x1e   :  { %p973_p0 = por %p972_p13, %p971_p12 }
  0x20   :  { %p974_p1 = pnand %p973_p0, %p967_p11 }
  0x22   :  { %977 = shalt.err (!%p974_p1)
}
  0x23   :  { %27 = dma.hbm_to_vmem [thread:$0]  %s1209_s0, 256, %s1102_s27, [#allocation4], %s1054_s13, %s1054_s13, %s1055_s14  }
  0x24   :  { %s1056_s26 = smov [#allocation8]   ;;  %s1057_s29 = smov [#allocation9]  }
  0x25   :  { %s47_s28 = sshll.u32 %s1056_s26, 4  ;;  %s61_s30 = sshll.u32 %s1057_s29, 4  ;;  %s48_s28 = int_to_ptr.vmem [resolvable:$true] %s47_s28  ;;  %s1139_s30 = int_to_ptr.vmem [resolvable:$true] %s61_s30 }
  0x26   :  { %s978_s10 = scalar_lea.hbm %s1212_s3, 4096 }
  0x27   :  { %p979_p2 = scmp.ne.s32.totalorder %s1212_s3, %s978_s10  ;;  %p982_p3 = scmp.lt.u32.totalorder %s978_s10, %s1212_s3 }
  0x29   :  { %p984_p4 = pnand %p982_p3, %p979_p2 }
  0x2b   :  { %987 = shalt.err (!%p984_p4)
}
  0x2c   :  { %s988_s0 = scalar_lea.vmem %s48_s28, 4096  ;;  %p993_p6 = scmp.lt.s32.totalorder %s48_s28, %s48_s28 }
  0x2d   :  { %p989_p5 = scmp.ne.s32.totalorder %s48_s28, %s988_s0  ;;  %p994_p7 = scmp.lt.s32.totalorder %s988_s0, %s988_s0 }
  0x2f   :  { %p995_p8 = por %p994_p7, %p993_p6 }
  0x31   :  { %p996_p9 = pnand %p995_p8, %p989_p5 }
  0x33   :  { %999 = shalt.err (!%p996_p9)
}
  0x34   :  { %53 = dma.hbm_to_vmem [thread:$0]  %s1212_s3, 4096, %s48_s28, [#allocation7], %s1054_s13, %s1054_s13, %s1055_s14  }
  0x35   :  { %s1000_s20 = scalar_lea.hbm %s1214_s5, 2048 }
  0x36   :  { %p1001_p10 = scmp.ne.s32.totalorder %s1214_s5, %s1000_s20  ;;  %p1004_p11 = scmp.lt.u32.totalorder %s1000_s20, %s1214_s5 }
  0x38   :  { %p1006_p12 = pnand %p1004_p11, %p1001_p10 }
  0x3a   :  { %1009 = shalt.err (!%p1006_p12)
}
  0x3b   :  { %s1010_s1 = scalar_lea.vmem %s1139_s30, 2048  ;;  %p1015_p0 = scmp.lt.s32.totalorder %s1139_s30, %s1139_s30 }
  0x3c   :  { %p1011_p13 = scmp.ne.s32.totalorder %s1139_s30, %s1010_s1  ;;  %p1016_p1 = scmp.lt.s32.totalorder %s1010_s1, %s1010_s1 }
  0x3e   :  { %p1017_p2 = por %p1016_p1, %p1015_p0 }
  0x40   :  { %p1018_p3 = pnand %p1017_p2, %p1011_p13 }
  0x42   :  { %1021 = shalt.err (!%p1018_p3)
}
  0x43   :  { %s1058_s3 = smov 64   ;;  %s1059_s25 = smov 4  }
  0x44   :  { %67 = dma.hbm_to_vmem [thread:$0]  %s1214_s5, 2048, %s1139_s30, [#allocation10], %s1058_s3, %s1058_s3, %s1059_s25  }
  0x45   :  { %1044 = dma.done.wait [#allocation4], 256  }
  0x46   :  { %1045 = vsyncadd [#allocation4], 4294967040 }
  0x47   :  { %1046 = dma.done.wait [#allocation7], 6144  }
  0x48   :  { %1047 = vsyncadd [#allocation7], 4294961152 }
  0x49   :  { %1048 = dma.done.wait [#allocation10], 2048  }
  0x4a   :  { %1049 = vsyncadd [#allocation10], 4294965248  ;;  %v1060_v0 = vmov 0   ;;  %v830_v1 = vld [vmem:[#allocation6 + $0x4] ss:$8 sps:$4 sm:$0xff]   ;;  %v83_v26 = vld [vmem:[#allocation3] sm:$0xff]  ;;  %v104_v56 = vlaneseq }
  0x4b   :  { %226 = vmatprep.mubr.bf16.mxu0 %v1060_v0  ;;  %v832_v2 = vld [vmem:[#allocation6] ss:$8 sps:$4 sm:$0xff]   ;;  %194 = vmatprep.subr.bf16.mxu0 %v830_v1  ;;  %v833_v3 = vld [vmem:[#allocation6 + $0x14] ss:$8 sps:$4 sm:$0xff]   ;;  %v835_v4 = vld [vmem:[#allocation6 + $0x10] ss:$8 sps:$4 sm:$0xff]  }
  0x4c   :  { %195 = vmatpush1.bf16.msra.mxu0 %v832_v2  ;;  %v836_v5 = vld [vmem:[#allocation6 + $0x24] ss:$8 sps:$4 sm:$0xff]   ;;  %v838_v6 = vld [vmem:[#allocation6 + $0x20] ss:$8 sps:$4 sm:$0xff]   ;;  %v839_v7 = vld [vmem:[#allocation6 + $0x34] ss:$8 sps:$4 sm:$0xff]  }
  0x4d   :  { %196 = vmatprep.subr.bf16.mxu0 %v833_v3  ;;  %v841_v8 = vld [vmem:[#allocation6 + $0x30] ss:$8 sps:$4 sm:$0xff]   ;;  %v842_v9 = vld [vmem:[#allocation6 + $0x44] ss:$8 sps:$4 sm:$0xff]   ;;  %v856_v11 = vld [vmem:[#allocation8] ss:$8 sps:$4 sm:$0xff]  }
  0x4e   :  { %v854_v10 = vld [vmem:[#allocation8 + $0x4] ss:$8 sps:$4 sm:$0xff]   ;;  %v857_v12 = vld [vmem:[#allocation8 + $0x14] ss:$8 sps:$4 sm:$0xff]   ;;  %v844_v13 = vld [vmem:[#allocation6 + $0x40] ss:$8 sps:$4 sm:$0xff]  }
  0x4f   :  { %467 = vmatprep.subr.bf16.mxu1 %v854_v10  ;;  %v859_v14 = vld [vmem:[#allocation8 + $0x10] ss:$8 sps:$4 sm:$0xff]   ;;  %v845_v15 = vld [vmem:[#allocation6 + $0x54] ss:$8 sps:$4 sm:$0xff]   ;;  %v860_v16 = vld [vmem:[#allocation8 + $0x24] ss:$8 sps:$4 sm:$0xff]  }
  0x50   :  { %197 = vmatpush1.bf16.msra.mxu0 %v835_v4  ;;  %468 = vmatpush1.bf16.msra.mxu1 %v856_v11  ;;  %v847_v17 = vld [vmem:[#allocation6 + $0x50] ss:$8 sps:$4 sm:$0xff]   ;;  %v862_v18 = vld [vmem:[#allocation8 + $0x20] ss:$8 sps:$4 sm:$0xff]   ;;  %v848_v19 = vld [vmem:[#allocation6 + $0x64] ss:$8 sps:$4 sm:$0xff]  }
  0x51   :  { %198 = vmatprep.subr.bf16.mxu0 %v836_v5  ;;  %469 = vmatprep.subr.bf16.mxu1 %v857_v12  ;;  %v863_v20 = vld [vmem:[#allocation8 + $0x34] ss:$8 sps:$4 sm:$0xff]   ;;  %v850_v21 = vld [vmem:[#allocation6 + $0x60] ss:$8 sps:$4 sm:$0xff]   ;;  %v865_v22 = vld [vmem:[#allocation8 + $0x30] ss:$8 sps:$4 sm:$0xff]  }
  0x52   :  { %v851_v23 = vld [vmem:[#allocation6 + $0x74] ss:$8 sps:$4 sm:$0xff]   ;;  %v866_v24 = vld [vmem:[#allocation8 + $0x44] ss:$8 sps:$4 sm:$0xff]   ;;  %v853_v25 = vld [vmem:[#allocation6 + $0x70] ss:$8 sps:$4 sm:$0xff]  }
  0x53   :  { %v84_v27 = vld [vmem:[#allocation3 + $0x8] sm:$0xff]  ;;  %v868_v28 = vld [vmem:[#allocation8 + $0x40] ss:$8 sps:$4 sm:$0xff]   ;;  %v872_v32 = vld [vmem:[#allocation8 + $0x64] ss:$8 sps:$4 sm:$0xff]   ;;  %v1173_v57 = vshrl.u32 %v104_v56, 7 }
  0x54   :  { %199 = vmatpush1.bf16.msra.mxu0 %v838_v6  ;;  %470 = vmatpush1.bf16.msra.mxu1 %v859_v14  ;;  %v869_v29 = vld [vmem:[#allocation8 + $0x54] ss:$8 sps:$4 sm:$0xff]   ;;  %v871_v30 = vld [vmem:[#allocation8 + $0x50] ss:$8 sps:$4 sm:$0xff]   ;;  %v85_v31 = vpack.c.bf16 %v84_v27, %v83_v26  ;;  %v874_v33 = vld [vmem:[#allocation8 + $0x60] ss:$8 sps:$4 sm:$0xff]  }
  0x55   :  { %200 = vmatprep.subr.bf16.mxu0 %v839_v7  ;;  %471 = vmatprep.subr.bf16.mxu1 %v860_v16  ;;  %v875_v34 = vld [vmem:[#allocation8 + $0x74] ss:$8 sps:$4 sm:$0xff]   ;;  %v877_v35 = vld [vmem:[#allocation8 + $0x70] ss:$8 sps:$4 sm:$0xff]   ;;  %v878_v36 = vld [vmem:[#allocation8 + $0x84] ss:$8 sps:$4 sm:$0xff]  }
  0x56   :  { %v880_v37 = vld [vmem:[#allocation8 + $0x80] ss:$8 sps:$4 sm:$0xff]   ;;  %v881_v38 = vld [vmem:[#allocation8 + $0x94] ss:$8 sps:$4 sm:$0xff]   ;;  %v883_v39 = vld [vmem:[#allocation8 + $0x90] ss:$8 sps:$4 sm:$0xff]  }
  0x57   :  { %v884_v40 = vld [vmem:[#allocation8 + $0xa4] ss:$8 sps:$4 sm:$0xff]   ;;  %v886_v41 = vld [vmem:[#allocation8 + $0xa0] ss:$8 sps:$4 sm:$0xff]   ;;  %v887_v42 = vld [vmem:[#allocation8 + $0xb4] ss:$8 sps:$4 sm:$0xff]  }
  0x58   :  { %201 = vmatpush1.bf16.msra.mxu0 %v841_v8  ;;  %472 = vmatpush1.bf16.msra.mxu1 %v862_v18  ;;  %v889_v43 = vld [vmem:[#allocation8 + $0xb0] ss:$8 sps:$4 sm:$0xff]   ;;  %v890_v44 = vld [vmem:[#allocation8 + $0xc4] ss:$8 sps:$4 sm:$0xff]   ;;  %v892_v45 = vld [vmem:[#allocation8 + $0xc0] ss:$8 sps:$4 sm:$0xff]  }
  0x59   :  { %202 = vmatprep.subr.bf16.mxu0 %v842_v9  ;;  %473 = vmatprep.subr.bf16.mxu1 %v863_v20  ;;  %v893_v46 = vld [vmem:[#allocation8 + $0xd4] ss:$8 sps:$4 sm:$0xff]   ;;  %v895_v47 = vld [vmem:[#allocation8 + $0xd0] ss:$8 sps:$4 sm:$0xff]   ;;  %v896_v48 = vld [vmem:[#allocation8 + $0xe4] ss:$8 sps:$4 sm:$0xff]  }
  0x5a   :  { %v898_v49 = vld [vmem:[#allocation8 + $0xe0] ss:$8 sps:$4 sm:$0xff]   ;;  %v899_v50 = vld [vmem:[#allocation8 + $0xf4] ss:$8 sps:$4 sm:$0xff]   ;;  %v901_v51 = vld [vmem:[#allocation8 + $0xf0] ss:$8 sps:$4 sm:$0xff]  }
  0x5b   :  { %v902_v52 = vld [vmem:[#allocation9 + $0x40] sm:$0xff]   ;;  %v904_v54 = vld [vmem:[#allocation9 + $0x48] sm:$0xff]   ;;  %v106_v58 = vsub.s32 0, %v1173_v57  ;;  %v102_v59 = vld [vmem:[%s1211_s2] sm:$0x3]  ;;  %v110_v60 = vsub.s32 1, %v1173_v57 }
  0x5c   :  { %203 = vmatpush1.bf16.msra.mxu0 %v844_v13  ;;  %474 = vmatpush1.bf16.msra.mxu1 %v865_v22  ;;  %v903_v53 = vld [vmem:[#allocation9] sm:$0xff]   ;;  %v905_v55 = vld [vmem:[#allocation9 + $0x8] sm:$0xff]   ;;  %s1061_s9 = smov [#allocation11]  }
  0x5d   :  { %204 = vmatprep.subr.bf16.mxu0 %v845_v15  ;;  %475 = vmatprep.subr.bf16.mxu1 %v866_v24  ;;  %v107_v61 = vrot.slane %v102_v59, %v106_v58  ;;  %v111_v62 = vrot.slane %v102_v59, %v110_v60  ;;  %s719_s10 = sshll.u32 %s1061_s9, 4  ;;  %s720_s10 = int_to_ptr.vmem [resolvable:$true] %s719_s10 }
  0x5e   :  { %s1022_s11 = scalar_lea.vmem %s720_s10, 256  ;;  %p1027_p5 = scmp.lt.s32.totalorder %s720_s10, %s720_s10 }
  0x5f   :  { %p1023_p4 = scmp.ne.s32.totalorder %s720_s10, %s1022_s11  ;;  %p1028_p6 = scmp.lt.s32.totalorder %s1022_s11, %s1022_s11 }
  0x60   :  { %205 = vmatpush1.bf16.msra.mxu0 %v847_v17  ;;  %476 = vmatpush1.bf16.msra.mxu1 %v868_v28 }
  0x61   :  { %206 = vmatprep.subr.bf16.mxu0 %v848_v19  ;;  %477 = vmatprep.subr.bf16.mxu1 %v869_v29  ;;  %v906_v29 = vld [vmem:[#allocation9 + $0x50] sm:$0xff]   ;;  %p1029_p7 = por %p1028_p6, %p1027_p5 }
  0x63   :  { %p1030_p8 = pnand %p1029_p7, %p1023_p4 }
  0x64   :  { %207 = vmatpush1.bf16.msra.mxu0 %v850_v21  ;;  %478 = vmatpush1.bf16.msra.mxu1 %v871_v30  ;;  %v907_v30 = vld [vmem:[#allocation9 + $0x10] sm:$0xff]  }
  0x65   :  { %208 = vmatprep.subr.bf16.mxu0 %v851_v23  ;;  %479 = vmatprep.subr.bf16.mxu1 %v872_v32  ;;  %v909_v32 = vld [vmem:[#allocation9 + $0x18] sm:$0xff]  }
  0x68   :  { %209 = vmatpush1.bf16.msra.mxu0 %v853_v25  ;;  %480 = vmatpush1.bf16.msra.mxu1 %v874_v33  ;;  %v910_v33 = vld [vmem:[#allocation9 + $0x60] sm:$0xff]  }
  0x69   :  { %481 = vmatprep.subr.bf16.mxu1 %v875_v34  ;;  %798 = vmatprep.subr.bf16.mxu0 %v902_v52  ;;  %v911_v34 = vld [vmem:[#allocation9 + $0x20] sm:$0xff]  }
  0x6b   :  { %227 = vmatmul.mubr.bf16.vlgmr.msra.gmra.mrb[0].mxu0 %v85_v31  ;;  %v908_v31 = vld [vmem:[#allocation9 + $0x58] sm:$0xff]  }
  0x6c   :  { %482 = vmatpush1.bf16.msra.mxu1 %v877_v35  ;;  %799 = vmatpush3.bf16.msra.mxu0 %v903_v53  ;;  %v912_v35 = vld [vmem:[#allocation9 + $0x68] sm:$0xff]  }
  0x6d   :  { %483 = vmatprep.subr.bf16.mxu1 %v878_v36  ;;  %800 = vmatprep.subr.bf16.mxu0 %v904_v54  ;;  %v913_v36 = vld [vmem:[#allocation9 + $0x28] sm:$0xff]  }
  0x70   :  { %484 = vmatpush1.bf16.msra.mxu1 %v880_v37  ;;  %801 = vmatpush3.bf16.msra.mxu0 %v905_v55  ;;  %v914_v37 = vld [vmem:[#allocation9 + $0x70] sm:$0xff]  }
  0x71   :  { %485 = vmatprep.subr.bf16.mxu1 %v881_v38  ;;  %802 = vmatprep.subr.bf16.mxu0 %v906_v29  ;;  %v915_v38 = vld [vmem:[#allocation9 + $0x30] sm:$0xff]  }
  0x74   :  { %486 = vmatpush1.bf16.msra.mxu1 %v883_v39  ;;  %803 = vmatpush3.bf16.msra.mxu0 %v907_v30  ;;  %v916_v39 = vld [vmem:[#allocation9 + $0x78] sm:$0xff]  }
  0x75   :  { %487 = vmatprep.subr.bf16.mxu1 %v884_v40  ;;  %804 = vmatprep.subr.bf16.mxu0 %v908_v31  ;;  %v917_v40 = vld [vmem:[#allocation9 + $0x38] sm:$0xff]  }
  0x78   :  { %488 = vmatpush1.bf16.msra.mxu1 %v886_v41  ;;  %805 = vmatpush3.bf16.msra.mxu0 %v909_v32  ;;  %v295_v41 = vld [vmem:[%s1213_s4] sm:$0x3] }
  0x79   :  { %489 = vmatprep.subr.bf16.mxu1 %v887_v42  ;;  %806 = vmatprep.subr.bf16.mxu0 %v910_v33  ;;  %v300_v42 = vrot.slane %v295_v41, %v106_v58 }
  0x7c   :  { %490 = vmatpush1.bf16.msra.mxu1 %v889_v43  ;;  %807 = vmatpush3.bf16.msra.mxu0 %v911_v34  ;;  %v304_v43 = vrot.slane %v295_v41, %v110_v60 }
  0x7d   :  { %491 = vmatprep.subr.bf16.mxu1 %v890_v44  ;;  %808 = vmatprep.subr.bf16.mxu0 %v912_v35 }
  0x80   :  { %492 = vmatpush1.bf16.msra.mxu1 %v892_v45  ;;  %809 = vmatpush3.bf16.msra.mxu0 %v913_v36 }
  0x81   :  { %493 = vmatprep.subr.bf16.mxu1 %v893_v46  ;;  %810 = vmatprep.subr.bf16.mxu0 %v914_v37 }
  0x84   :  { %494 = vmatpush1.bf16.msra.mxu1 %v895_v47  ;;  %811 = vmatpush3.bf16.msra.mxu0 %v915_v38 }
  0x85   :  { %495 = vmatprep.subr.bf16.mxu1 %v896_v48  ;;  %812 = vmatprep.subr.bf16.mxu0 %v916_v39 }
  0x88   :  { %496 = vmatpush1.bf16.msra.mxu1 %v898_v49  ;;  %813 = vmatpush3.bf16.msra.mxu0 %v917_v40 }
  0x89   :  { %497 = vmatprep.subr.bf16.mxu1 %v899_v50 }
  0x8c   :  { %498 = vmatpush1.bf16.msra.mxu1 %v901_v51 }
 0x13e   :  { %v228_v63 = vpop.f32.mrb[0].mxu0 }
 0x13f   :  { %v229_v0 = vadd.f32 %v228_v63, %v107_v61  ;;  %v230_v1 = vpop.f32.mrb[1].mxu0 }
 0x140   :  { %v231_v2 = vadd.f32 %v230_v1, %v111_v62  ;;  %v232_v3 = vpop.f32.mrb[2].mxu0 }
 0x141   :  { %v241_v4 = vmul.f32 0.70710677, %v229_v0  ;;  %v233_v5 = vadd.f32 %v232_v3, %v107_v61  ;;  %v234_v6 = vpop.f32.mrb[3].mxu0  ;;  %v237_v17 = vmul.f32 0.5, %v229_v0 }
 0x142   :  { %v242_v7 = vmul.f32 0.70710677, %v231_v2  ;;  %v235_v8 = vadd.f32 %v234_v6, %v111_v62  ;;  %v238_v20 = vmul.f32 0.5, %v231_v2 }
 0x143   :  { %918 = verf.f32 %v241_v4  ;;  %v243_v9 = vmul.f32 0.70710677, %v233_v5  ;;  %v239_v18 = vmul.f32 0.5, %v233_v5 }
 0x144   :  { %920 = verf.f32 %v242_v7  ;;  %v244_v10 = vmul.f32 0.70710677, %v235_v8  ;;  %v240_v21 = vmul.f32 0.5, %v235_v8 }
 0x145   :  { %922 = verf.f32 %v243_v9 }
 0x146   :  { %924 = verf.f32 %v244_v10 }
 0x14d   :  { %v919_v11 = vpop.eup %918 }
 0x14e   :  { %v921_v12 = vpop.eup %920  ;;  %v249_v13 = vadd.f32 1.0, %v919_v11  ;;  %v781_v11 = vld [vmem:[%s1215_s6] ss:$0 sm:$0xff] }
 0x14f   :  { %v923_v14 = vpop.eup %922  ;;  %v250_v15 = vadd.f32 1.0, %v921_v12 }
 0x150   :  { %v925_v16 = vpop.eup %924  ;;  %v251_v19 = vadd.f32 1.0, %v923_v14  ;;  %v253_v23 = vmul.f32 %v249_v13, %v237_v17 }
 0x151   :  { %v252_v22 = vadd.f32 1.0, %v925_v16  ;;  %v254_v25 = vmul.f32 %v250_v15, %v238_v20 }
 0x152   :  { %v255_v24 = vmul.f32 %v251_v19, %v239_v18 }
 0x153   :  { %v256_v26 = vmul.f32 %v252_v22, %v240_v21 }
 0x154   :  { %v257_v27 = vpack.c.bf16 %v255_v24, %v253_v23 }
 0x155   :  { %v258_v28 = vpack.c.bf16 %v256_v26, %v254_v25 }
 0x157   :  { %499 = vmatprep.mubr.bf16.mxu1 %v258_v28 }
 0x158   :  { %500 = vmatmul.mubr.bf16.vlgmr.msra.gmra.mrb[0].mxu1 %v257_v27 }
 0x22b   :  { %v501_v44 = vpop.f32.mrb[0].mxu1 }
 0x22c   :  { %v502_v45 = vadd.f32 %v501_v44, %v300_v42  ;;  %v503_v46 = vpop.f32.mrb[1].mxu1 }
 0x22d   :  { %v504_v47 = vadd.f32 %v503_v46, %v304_v43  ;;  %v505_v48 = vpop.f32.mrb[2].mxu1 }
 0x22e   :  { %v514_v49 = vmul.f32 0.70710677, %v502_v45  ;;  %v506_v50 = vadd.f32 %v505_v48, %v300_v42  ;;  %v507_v51 = vpop.f32.mrb[3].mxu1  ;;  %v510_v62 = vmul.f32 0.5, %v502_v45 }
 0x22f   :  { %v515_v52 = vmul.f32 0.70710677, %v504_v47  ;;  %v508_v53 = vadd.f32 %v507_v51, %v304_v43  ;;  %v511_v1 = vmul.f32 0.5, %v504_v47 }
 0x230   :  { %926 = verf.f32 %v514_v49  ;;  %v516_v54 = vmul.f32 0.70710677, %v506_v50  ;;  %v512_v63 = vmul.f32 0.5, %v506_v50 }
 0x231   :  { %928 = verf.f32 %v515_v52  ;;  %v517_v55 = vmul.f32 0.70710677, %v508_v53  ;;  %v513_v2 = vmul.f32 0.5, %v508_v53 }
 0x232   :  { %930 = verf.f32 %v516_v54 }
 0x233   :  { %932 = verf.f32 %v517_v55 }
 0x23a   :  { %v927_v56 = vpop.eup %926 }
 0x23b   :  { %v929_v58 = vpop.eup %928  ;;  %v522_v57 = vadd.f32 1.0, %v927_v56 }
 0x23c   :  { %v931_v59 = vpop.eup %930  ;;  %v523_v60 = vadd.f32 1.0, %v929_v58 }
 0x23d   :  { %v933_v61 = vpop.eup %932  ;;  %v524_v0 = vadd.f32 1.0, %v931_v59  ;;  %v526_v4 = vmul.f32 %v522_v57, %v510_v62 }
 0x23e   :  { %v525_v3 = vadd.f32 1.0, %v933_v61  ;;  %v527_v6 = vmul.f32 %v523_v60, %v511_v1 }
 0x23f   :  { %v528_v5 = vmul.f32 %v524_v0, %v512_v63 }
 0x240   :  { %v529_v7 = vmul.f32 %v525_v3, %v513_v2 }
 0x241   :  { %v530_v8 = vpack.c.bf16 %v528_v5, %v526_v4 }
 0x242   :  { %v531_v9 = vpack.c.bf16 %v529_v7, %v527_v6 }
 0x244   :  { %703 = vmatprep.mubr.bf16.mxu0 %v531_v9 }
 0x245   :  { %704 = vmatmul.mubr.bf16.vlgmr.msra.gmra.mrb[4].mxu0 %v530_v8 }
 0x318   :  { %v814_v10 = vpop.f32.mrb[4].mxu0 }
 0x319   :  { %v815_v12 = vpop.f32.mrb[5].mxu0 }
 0x31a   :  { %v816_v13 = vadd.f32 %v815_v12, %v814_v10  ;;  %v817_v14 = vpop.f32.mrb[6].mxu0 }
 0x31b   :  { %v818_v15 = vpop.f32.mrb[7].mxu0 }
 0x31c   :  { %v706_v16 = vadd.f32 %v816_v13, %v781_v11  ;;  %v819_v17 = vadd.f32 %v818_v15, %v817_v14 }
 0x31e   :  { %712 = vst [vmem:[#allocation11] sm:$0xff] %v706_v16  ;;  %v709_v18 = vadd.f32 %v819_v17, %v781_v11 }
 0x320   :  { %713 = vst [vmem:[#allocation11 + $0x8] sm:$0xff] %v709_v18 }
 0x321   :  { %1033 = shalt.err (!%p1030_p8)
}
 0x322   :  { %s1034_s15 = scalar_lea.hbm %s1216_s7, 256 }
 0x323   :  { %p1035_p9 = scmp.ne.s32.totalorder %s1216_s7, %s1034_s15  ;;  %p1038_p10 = scmp.lt.u32.totalorder %s1034_s15, %s1216_s7 }
 0x325   :  { %p1040_p11 = pnand %p1038_p10, %p1035_p9 }
 0x327   :  { %1043 = shalt.err (!%p1040_p11)
}
 0x328   :  { %725 = dma.vmem_to_hbm [thread:$0]  %s720_s10, 256, %s1216_s7, [#allocation5], %s1054_s13, %s1054_s13, %s1055_s14  }
 0x329   :  { %1050 = dma.done.wait [#allocation5], 256  }
 0x32a   :  { %1051 = vsyncadd [#allocation5], 4294967040 }
 0x32b   :  { %729 = vsyncpa [#allocation4], 1 }
 0x32c   :  { %730 = vsyncpa [#allocation7], 1 }
 0x32d   :  { %731 = vsyncpa [#allocation10], 1 }
 0x32e   :  { %732 = vsyncpa [#allocation5], 1 }

</bundles_post_ra>
